<compile_context>
chip_gen: v7x
topology: tpu7x:2x2x1
jax: 0.10.0
libtpu: 0.0.40
codegen_flags: <defaults>
</compile_context>

<pallas_src>
import jax
import jax.numpy as jnp
from jax.experimental import pallas as pl
from jax.experimental.pallas import tpu as pltpu


def _roundup(a, b):
    return ((a + b - 1) // b) * b


def _cdiv(a, b):
    return -(-a // b)


def _pick_tiles(b, target_tile):
    """Row-tile size + padded batch: multiple of 8 (sublane), minimal padding,
    and >= 2 grid steps when there is enough work (v7x has two TensorCores)."""
    n_tiles = _cdiv(b, target_tile)
    if n_tiles < 2 and b > 64:
        n_tiles = 2
    n_tiles = max(n_tiles, 1)
    tile_b = _roundup(_cdiv(b, n_tiles), 8)
    return tile_b, tile_b * n_tiles


# ----------------------------------------------------------------------------
# Kernel: for one tile of batch rows, evaluate the MLP for all S+1 t-values at
# once.  Weights/biases are small full blocks resident across all grid steps.
# ----------------------------------------------------------------------------
def _make_kernel(n_hidden, matmul_dtype=None):
    """n_hidden = number of hidden Linear layers (>= 1)."""

    def mm(a, w):
        if matmul_dtype is not None:           # optional bf16 MXU fast path
            a = a.astype(matmul_dtype)
            w = w.astype(matmul_dtype)
        return jnp.dot(a, w, preferred_element_type=jnp.float32)

    def kernel(*refs):
        x_ref, t_ref = refs[0], refs[1]
        out_ref = refs[-1]
        w1x_ref, w1t_ref, b1_ref = refs[2], refs[3], refs[4]
        rest = [(refs[5 + 2 * k], refs[6 + 2 * k]) for k in range(n_hidden - 1)]
        wy_ref = refs[5 + 2 * (n_hidden - 1)]
        by_ref = refs[6 + 2 * (n_hidden - 1)]

        x = x_ref[...]                          # (tb, D)
        t3 = t_ref[...]                         # (sp, tb, 1)  per-row t values
        tb = x.shape[0]
        sp = t3.shape[0]

        # First layer, factored: x-projection is shared by all sp t-samples.
        xa = mm(x, w1x_ref[...]) + b1_ref[...]                          # (tb, H1)
        h3 = jnp.maximum(xa[None, :, :] + t3 * w1t_ref[...][None, :, :],
                         0.0)                                           # (sp, tb, H1)

        # Remaining hidden layers: ONE big (sp*tb, H) matmul per layer.
        if rest:
            h2 = h3.reshape(sp * tb, h3.shape[-1])   # tb % 8 == 0 -> layout-aligned
            for w_ref, b_ref in rest:
                h2 = jnp.maximum(mm(h2, w_ref[...]) + b_ref[...], 0.0)
            h3 = h2.reshape(sp, tb, h2.shape[-1])

        # y_layer (1-wide): VPU broadcast-multiply + keepdims lane reduction,
        # writing the whole dense (sp, tb, 1) output block at once.
        y3 = jnp.sum(h3 * wy_ref[...][None, :, :], axis=-1, keepdims=True)
        out_ref[...] = y3 + by_ref[...][None, :, :]

    return kernel


def mc_mlp_pallas(x, t_all, weights, biases, wy, by, *,
                  target_tile=1024, matmul_dtype=None):
    """x: (B, D) f32; t_all: (S+1, B) f32 (row 0 = t, rows 1.. = MC draws).

    weights[i]: (in_i, out_i); biases[i]: (1, out_i); wy: (H_last, 1); by: (1, 1).
    Returns (S+1, B) f32: row 0 is y, rows 1.. are y_array for each MC sample.
    """
    b, d = x.shape
    sp = t_all.shape[0]
    n_hidden = len(weights)

    tile_b, b_pad = _pick_tiles(b, target_tile)
    if b_pad != b:
        # Only the compact (B, D)/(S+1, B) inputs are padded (a few KB), never
        # an S-expanded slab, so this copy is negligible HBM traffic.
        x = jnp.pad(x, ((0, b_pad - b), (0, 0)))
        t_all = jnp.pad(t_all, ((0, 0), (0, b_pad - b)))
    t3 = t_all[:, :, None]                      # (sp, b_pad, 1): batch on sublanes
    grid = (b_pad // tile_b,)

    w1 = weights[0]
    w1x, w1t = w1[:d, :], w1[d:, :]             # (D, H1), (1, H1)
    wy_row = wy.reshape(1, -1)                  # (1, H_last)

    operands = [x, t3, w1x, w1t, biases[0]]
    in_specs = [
        pl.BlockSpec((tile_b, d), lambda i: (i, 0)),
        pl.BlockSpec((sp, tile_b, 1), lambda i: (0, i, 0)),
        pl.BlockSpec(w1x.shape, lambda i: (0, 0)),
        pl.BlockSpec(w1t.shape, lambda i: (0, 0)),
        pl.BlockSpec(biases[0].shape, lambda i: (0, 0)),
    ]
    for w, bb in zip(weights[1:], biases[1:]):
        operands += [w, bb]
        in_specs += [pl.BlockSpec(w.shape, lambda i: (0, 0)),
                     pl.BlockSpec(bb.shape, lambda i: (0, 0))]
    operands += [wy_row, by]
    in_specs += [pl.BlockSpec(wy_row.shape, lambda i: (0, 0)),
                 pl.BlockSpec(by.shape, lambda i: (0, 0))]

    # Advisory cost + explicit VMEM budget (v5e default scoped VMEM is 16 MiB).
    h_dims = [w.shape[1] for w in weights]
    param_bytes = 4 * (sum(w.size for w in weights) + sum(bb.size for bb in biases)
                       + wy.size + by.size)
    hidden_mac = sum(w.shape[0] * w.shape[1] for w in weights[1:])
    flops = (2 * b_pad * d * h_dims[0]
             + 3 * b_pad * sp * h_dims[0]
             + 2 * b_pad * sp * hidden_mac
             + 2 * b_pad * sp * h_dims[-1])
    bytes_accessed = 4 * (b_pad * d + 2 * b_pad * sp) + param_bytes
    act_bytes = 4 * 3 * sp * tile_b * max(max(h_dims), 128)   # live activations (lane-padded)
    io_bytes = 4 * 2 * (tile_b * d + 2 * sp * tile_b)         # double-buffered in/out tiles
    vmem_limit = int(min(max(2 * param_bytes + act_bytes + io_bytes + (4 << 20),
                             32 << 20), 64 << 20))

    out3 = pl.pallas_call(
        _make_kernel(n_hidden, matmul_dtype),
        out_shape=jax.ShapeDtypeStruct((sp, b_pad, 1), jnp.float32),
        grid=grid,
        in_specs=in_specs,
        out_specs=pl.BlockSpec((sp, tile_b, 1), lambda i: (0, i, 0)),
        compiler_params=pltpu.CompilerParams(
            dimension_semantics=("parallel",),
            vmem_limit_bytes=vmem_limit),
        cost_estimate=pl.CostEstimate(
            flops=int(flops), transcendentals=0,
            bytes_accessed=int(bytes_accessed)),
    )(*operands)

    return out3[:, :b, 0]                       # (sp, B)


# ----------------------------------------------------------------------------
# Module wrapper (parameter init + forward glue in plain JAX).
# ----------------------------------------------------------------------------
class LearnedPdfMcMlp:
    def __init__(self, vector_dim, hidden_dims, target_range,
                 mc_samples=10, seed=123):
        if isinstance(hidden_dims, int):
            hidden_dims = [hidden_dims]
        self.vector_dim = vector_dim
        self.hidden_dims = list(hidden_dims)
        self.target_range = jnp.asarray(target_range, dtype=jnp.float32)
        self.mc_samples = mc_samples

        dims = [vector_dim + 1] + self.hidden_dims
        key = jax.random.PRNGKey(seed)
        self.weights, self.biases = [], []
        for din, dout in zip(dims[:-1], dims[1:]):
            key, kw, kb = jax.random.split(key, 3)
            bound = 1.0 / jnp.sqrt(jnp.float32(din))
            # stored as (in, out)  <=>  torch Linear weight (out, in) transposed
            self.weights.append(
                jax.random.uniform(kw, (din, dout), jnp.float32, -bound, bound))
            self.biases.append(
                jax.random.uniform(kb, (1, dout), jnp.float32, -bound, bound))
        key, kw, kb = jax.random.split(key, 3)
        bound = 1.0 / jnp.sqrt(jnp.float32(dims[-1]))
        self.wy = jax.random.uniform(kw, (dims[-1], 1), jnp.float32, -bound, bound)
        self.by = jax.random.uniform(kb, (1, 1), jnp.float32, -bound, bound)

    def forward(self, x, t, rng_key):
        b = x.shape[0]
        s = self.mc_samples
        lo, hi = self.target_range[0], self.target_range[1]

        # Compact sample-major t-table: row 0 = supplied t, rows 1.. = shared
        # MC draws.  ((S+1)*B floats -- the (B*S, D+1) slab is never built.)
        t_rand = jax.random.uniform(rng_key, (s,), jnp.float32) * (hi - lo) + lo
        t_all = jnp.concatenate(
            [t.reshape(1, -1), jnp.broadcast_to(t_rand[:, None], (s, b))], axis=0)

        out = mc_mlp_pallas(x, t_all, self.weights, self.biases, self.wy, self.by)
        y = out[0]                       # (B,)
        y_array = out[1:].T              # (B, S)
        return y, y_array

    # pure-JAX reference for verification
    def forward_ref(self, x, t, rng_key):
        def mlp(rows):
            h = rows
            for w, bb in zip(self.weights, self.biases):
                h = jnp.maximum(h @ w + bb, 0.0)
            return (h @ self.wy + self.by)[..., 0]

        b, d = x.shape
        s = self.mc_samples
        lo, hi = self.target_range[0], self.target_range[1]
        y = mlp(jnp.concatenate([x, t.reshape(-1, 1)], axis=1))
        t_rand = jax.random.uniform(rng_key, (s,), jnp.float32) * (hi - lo) + lo
        x_rep = jnp.broadcast_to(x[:, None, :], (b, s, d))
        t_rep = jnp.broadcast_to(t_rand[None, :, None], (b, s, 1))
        y_array = mlp(jnp.concatenate([x_rep, t_rep], axis=2))
        return y, y_array


if __name__ == "__main__":
    B, D = 2, 4
    HIDDEN = [32, 32]
    MC = 8

    model = LearnedPdfMcMlp(vector_dim=D, hidden_dims=HIDDEN,
                            target_range=(0.0, 1.0), mc_samples=MC, seed=123)

    key = jax.random.PRNGKey(0)
    kx, kt, kmc = jax.random.split(key, 3)
    x = jax.random.normal(kx, (B, D), jnp.float32)
    t = jax.random.uniform(kt, (B,), jnp.float32)

    y, y_array = model.forward(x, t, kmc)
    jax.block_until_ready((y, y_array))

    y_ref, y_array_ref = model.forward_ref(x, t, kmc)
    assert y.shape == (B,) and y_array.shape == (B, MC)
    assert jnp.allclose(y, y_ref, atol=1e-4, rtol=1e-4)
    assert jnp.allclose(y_array, y_array_ref, atol=1e-4, rtol=1e-4)

    # Also exercise the multi-tile ("parallel" grid, >=2 steps) path.
    B2 = 200
    kx2, kt2, kmc2 = jax.random.split(jax.random.PRNGKey(1), 3)
    x2 = jax.random.normal(kx2, (B2, D), jnp.float32)
    t2 = jax.random.uniform(kt2, (B2,), jnp.float32)
    y2, ya2 = model.forward(x2, t2, kmc2)
    jax.block_until_ready((y2, ya2))
    y2_ref, ya2_ref = model.forward_ref(x2, t2, kmc2)
    assert jnp.allclose(y2, y2_ref, atol=1e-4, rtol=1e-4)
    assert jnp.allclose(ya2, ya2_ref, atol=1e-4, rtol=1e-4)

    print("KERNEL_OK")
</pallas_src>

<mosaic_0001>
module attributes {stable_mosaic.version = 11 : i64} {
  func.func @kernel(%arg0: i32, %arg1: memref<8x4xf32, #tpu.memory_space<vmem>>, %arg2: memref<9x8x1xf32, #tpu.memory_space<vmem>>, %arg3: memref<4x32xf32, #tpu.memory_space<vmem>>, %arg4: memref<1x32xf32, #tpu.memory_space<vmem>>, %arg5: memref<1x32xf32, #tpu.memory_space<vmem>>, %arg6: memref<32x32xf32, #tpu.memory_space<vmem>>, %arg7: memref<1x32xf32, #tpu.memory_space<vmem>>, %arg8: memref<1x32xf32, #tpu.memory_space<vmem>>, %arg9: memref<1x1xf32, #tpu.memory_space<vmem>>, %arg10: memref<9x8x1xf32, #tpu.memory_space<vmem>>) attributes {dimension_semantics = [#tpu.dimension_semantics<parallel>], iteration_bounds = array<i64: 1>, scalar_prefetch = 0 : i64, scratch_operands = 0 : i64, tpu.core_type = #tpu.core_type<tc>, window_params = [{transform_indices = @transform_0, window_bounds = array<i64: 8, 4>}, {transform_indices = @transform_1, window_bounds = array<i64: 9, 8, 1>}, {pipeline_mode = #tpu.pipeline_mode<synchronous>, transform_indices = @transform_2, window_bounds = array<i64: 4, 32>}, {pipeline_mode = #tpu.pipeline_mode<synchronous>, transform_indices = @transform_3, window_bounds = array<i64: 1, 32>}, {pipeline_mode = #tpu.pipeline_mode<synchronous>, transform_indices = @transform_4, window_bounds = array<i64: 1, 32>}, {pipeline_mode = #tpu.pipeline_mode<synchronous>, transform_indices = @transform_5, window_bounds = array<i64: 32, 32>}, {pipeline_mode = #tpu.pipeline_mode<synchronous>, transform_indices = @transform_6, window_bounds = array<i64: 1, 32>}, {pipeline_mode = #tpu.pipeline_mode<synchronous>, transform_indices = @transform_7, window_bounds = array<i64: 1, 32>}, {pipeline_mode = #tpu.pipeline_mode<synchronous>, transform_indices = @transform_8, window_bounds = array<i64: 1, 1>}, {transform_indices = @transform_9, window_bounds = array<i64: 9, 8, 1>}]} {
    %c0 = arith.constant 0 : index
    %c0_0 = arith.constant 0 : index
    %0 = vector.load %arg1[%c0, %c0_0] : memref<8x4xf32, #tpu.memory_space<vmem>>, vector<8x4xf32>
    %c0_1 = arith.constant 0 : index
    %c0_2 = arith.constant 0 : index
    %c0_3 = arith.constant 0 : index
    %1 = vector.load %arg2[%c0_1, %c0_2, %c0_3] : memref<9x8x1xf32, #tpu.memory_space<vmem>>, vector<9x8x1xf32>
    %c0_4 = arith.constant 0 : index
    %c0_5 = arith.constant 0 : index
    %2 = vector.load %arg3[%c0_4, %c0_5] : memref<4x32xf32, #tpu.memory_space<vmem>>, vector<4x32xf32>
    %cst = arith.constant dense<0.000000e+00> : vector<8x32xf32>
    %3 = tpu.matmul %0, %2, %cst {dimension_numbers = #tpu.dot_dimension_numbers<[1], [0], [0], [1], [0, 0, 1, 1], [], []>} : vector<8x4xf32>, vector<4x32xf32>, vector<8x32xf32> -> vector<8x32xf32>
    %c0_6 = arith.constant 0 : index
    %c0_7 = arith.constant 0 : index
    %4 = vector.load %arg5[%c0_6, %c0_7] : memref<1x32xf32, #tpu.memory_space<vmem>>, vector<1x32xf32>
    %5 = vector.broadcast %4 : vector<1x32xf32> to vector<8x32xf32>
    %6 = arith.addf %3, %5 : vector<8x32xf32>
    %7 = vector.shape_cast %6 : vector<8x32xf32> to vector<1x8x32xf32>
    %c0_8 = arith.constant 0 : index
    %c0_9 = arith.constant 0 : index
    %8 = vector.load %arg4[%c0_8, %c0_9] : memref<1x32xf32, #tpu.memory_space<vmem>>, vector<1x32xf32>
    %9 = vector.shape_cast %8 : vector<1x32xf32> to vector<1x1x32xf32>
    %10 = vector.broadcast %1 : vector<9x8x1xf32> to vector<9x8x32xf32>
    %11 = vector.broadcast %9 : vector<1x1x32xf32> to vector<9x8x32xf32>
    %12 = arith.mulf %10, %11 : vector<9x8x32xf32>
    %13 = vector.broadcast %7 : vector<1x8x32xf32> to vector<9x8x32xf32>
    %14 = arith.addf %13, %12 : vector<9x8x32xf32>
    %cst_10 = arith.constant 0.000000e+00 : f32
    %15 = vector.broadcast %cst_10 : f32 to vector<9x8x32xf32>
    %16 = arith.maximumf %14, %15 : vector<9x8x32xf32>
    %17 = vector.shape_cast %16 : vector<9x8x32xf32> to vector<72x32xf32>
    %c0_11 = arith.constant 0 : index
    %c0_12 = arith.constant 0 : index
    %18 = vector.load %arg6[%c0_11, %c0_12] : memref<32x32xf32, #tpu.memory_space<vmem>>, vector<32x32xf32>
    %cst_13 = arith.constant dense<0.000000e+00> : vector<72x32xf32>
    %19 = tpu.matmul %17, %18, %cst_13 {dimension_numbers = #tpu.dot_dimension_numbers<[1], [0], [0], [1], [0, 0, 1, 1], [], []>} : vector<72x32xf32>, vector<32x32xf32>, vector<72x32xf32> -> vector<72x32xf32>
    %c0_14 = arith.constant 0 : index
    %c0_15 = arith.constant 0 : index
    %20 = vector.load %arg7[%c0_14, %c0_15] : memref<1x32xf32, #tpu.memory_space<vmem>>, vector<1x32xf32>
    %21 = vector.broadcast %20 : vector<1x32xf32> to vector<72x32xf32>
    %22 = arith.addf %19, %21 : vector<72x32xf32>
    %cst_16 = arith.constant 0.000000e+00 : f32
    %23 = vector.broadcast %cst_16 : f32 to vector<72x32xf32>
    %24 = arith.maximumf %22, %23 : vector<72x32xf32>
    %25 = vector.shape_cast %24 : vector<72x32xf32> to vector<9x8x32xf32>
    %c0_17 = arith.constant 0 : index
    %c0_18 = arith.constant 0 : index
    %26 = vector.load %arg8[%c0_17, %c0_18] : memref<1x32xf32, #tpu.memory_space<vmem>>, vector<1x32xf32>
    %27 = vector.shape_cast %26 : vector<1x32xf32> to vector<1x1x32xf32>
    %28 = vector.broadcast %27 : vector<1x1x32xf32> to vector<9x8x32xf32>
    %29 = arith.mulf %25, %28 : vector<9x8x32xf32>
    %cst_19 = arith.constant dense<0.000000e+00> : vector<9x8xf32>
    %30 = vector.multi_reduction <add>, %29, %cst_19 [2] : vector<9x8x32xf32> to vector<9x8xf32>
    %31 = vector.shape_cast %30 : vector<9x8xf32> to vector<9x8x1xf32>
    %c0_20 = arith.constant 0 : index
    %c0_21 = arith.constant 0 : index
    %32 = vector.load %arg9[%c0_20, %c0_21] : memref<1x1xf32, #tpu.memory_space<vmem>>, vector<1x1xf32>
    %33 = vector.shape_cast %32 : vector<1x1xf32> to vector<1x1x1xf32>
    %34 = vector.broadcast %33 : vector<1x1x1xf32> to vector<9x8x1xf32>
    %35 = arith.addf %31, %34 : vector<9x8x1xf32>
    %c0_22 = arith.constant 0 : index
    %c0_23 = arith.constant 0 : index
    %c0_24 = arith.constant 0 : index
    %36 = vector.load %arg10[%c0_22, %c0_23, %c0_24] : memref<9x8x1xf32, #tpu.memory_space<vmem>>, vector<9x8x1xf32>
    tpu.vector_store %arg10[%c0_22, %c0_23, %c0_24], %35 {strides = array<i32>} : memref<9x8x1xf32, #tpu.memory_space<vmem>>, vector<9x8x1xf32>,
    return
  }
  func.func @transform_0(%arg0: i32) -> (i32, i32) {
    %c0_i32 = arith.constant 0 : i32
    %c0_i32_0 = arith.constant 0 : i32
    return %arg0, %c0_i32 : i32, i32
  }
  func.func @transform_1(%arg0: i32) -> (i32, i32, i32) {
    %c0_i32 = arith.constant 0 : i32
    %c0_i32_0 = arith.constant 0 : i32
    %c0_i32_1 = arith.constant 0 : i32
    return %c0_i32, %arg0, %c0_i32_0 : i32, i32, i32
  }
  func.func @transform_2(%arg0: i32) -> (i32, i32) {
    %c0_i32 = arith.constant 0 : i32
    %c0_i32_0 = arith.constant 0 : i32
    %c0_i32_1 = arith.constant 0 : i32
    return %c0_i32, %c0_i32_0 : i32, i32
  }
  func.func @transform_3(%arg0: i32) -> (i32, i32) {
    %c0_i32 = arith.constant 0 : i32
    %c0_i32_0 = arith.constant 0 : i32
    %c0_i32_1 = arith.constant 0 : i32
    return %c0_i32, %c0_i32_0 : i32, i32
  }
  func.func @transform_4(%arg0: i32) -> (i32, i32) {
    %c0_i32 = arith.constant 0 : i32
    %c0_i32_0 = arith.constant 0 : i32
    %c0_i32_1 = arith.constant 0 : i32
    return %c0_i32, %c0_i32_0 : i32, i32
  }
  func.func @transform_5(%arg0: i32) -> (i32, i32) {
    %c0_i32 = arith.constant 0 : i32
    %c0_i32_0 = arith.constant 0 : i32
    %c0_i32_1 = arith.constant 0 : i32
    return %c0_i32, %c0_i32_0 : i32, i32
  }
  func.func @transform_6(%arg0: i32) -> (i32, i32) {
    %c0_i32 = arith.constant 0 : i32
    %c0_i32_0 = arith.constant 0 : i32
    %c0_i32_1 = arith.constant 0 : i32
    return %c0_i32, %c0_i32_0 : i32, i32
  }
  func.func @transform_7(%arg0: i32) -> (i32, i32) {
    %c0_i32 = arith.constant 0 : i32
    %c0_i32_0 = arith.constant 0 : i32
    %c0_i32_1 = arith.constant 0 : i32
    return %c0_i32, %c0_i32_0 : i32, i32
  }
  func.func @transform_8(%arg0: i32) -> (i32, i32) {
    %c0_i32 = arith.constant 0 : i32
    %c0_i32_0 = arith.constant 0 : i32
    %c0_i32_1 = arith.constant 0 : i32
    return %c0_i32, %c0_i32_0 : i32, i32
  }
  func.func @transform_9(%arg0: i32) -> (i32, i32, i32) {
    %c0_i32 = arith.constant 0 : i32
    %c0_i32_0 = arith.constant 0 : i32
    %c0_i32_1 = arith.constant 0 : i32
    return %c0_i32, %arg0, %c0_i32_0 : i32, i32, i32
  }
}

</mosaic_0001>

<bundles_post_ra>
// kernel: tpu_custom_call.1
= control target key start
LH: loop header
LB: loop body
LE: loop exit
PB: predicated region body
PF: predicated region fallthrough
CT: control target
= control target key end

     0   :  { %vm56_vm0 = vcmask 1043456   ;;  %vm52_vm1 = vcmask 31744   ;;  %v527_v0 = vmov 0.0   ;;  %vm528_vm2 = vmmov 0   ;;  %s716_s2 = inlined_call_operand.vmem [shape: f32[4,32], index: 2, kind: input, shape index: {}]   ;;  %s717_s0 = inlined_call_operand.vmem [shape: f32[8,4], index: 0, kind: input, shape index: {}]   ;;  %s718_s1 = inlined_call_operand.vmem [shape: f32[9,8,1], index: 1, kind: input, shape index: {}]   ;;  %s719_s5 = inlined_call_operand.vmem [shape: f32[32,32], index: 5, kind: input, shape index: {}]   ;;  %s720_s3 = inlined_call_operand.vmem [shape: f32[1,32], index: 3, kind: input, shape index: {}]   ;;  %s721_s4 = inlined_call_operand.vmem [shape: f32[1,32], index: 4, kind: input, shape index: {}]   ;;  %s722_s8 = inlined_call_operand.<no memory space> [shape: f32[1,1], index: 8, kind: input, shape index: {}]   ;;  %s723_s6 = inlined_call_operand.vmem [shape: f32[1,32], index: 6, kind: input, shape index: {}]   ;;  %s724_s7 = inlined_call_operand.vmem [shape: f32[1,32], index: 7, kind: input, shape index: {}]   ;;  %s725_s9 = inlined_call_operand.vmem [shape: f32[9,8,1], index: 9, kind: output, shape index: {}]  }
   0x1   :  { %471 = vmatprep.subr.mxu0 %v527_v0  ;;  %v44_v1 = vld [vmem:[%s716_s2] sm:$0xf]  ;;  %473 = vmatprep.mubr.msk.f32.mxu0 %vm528_vm2, %v527_v0  ;;  %v529_v4 = vmov 0   ;;  %v40_v5 = vld [vmem:[%s718_s1 + $0x28] sm:$0xff]  ;;  %v41_v8 = vld [vmem:[%s718_s1 + $0x30] sm:$0xff]  ;;  %v530_v13 = vmov 0.0|0.0   ;;  %v14_v61 = vstv %s722_s8 }
   0x2   :  { %v34_v2 = vld [vmem:[%s717_s0] sm:$0xff]  ;;  %472 = vmatpush3.msk.msra.mxu0 %vm56_vm0, %v44_v1  ;;  %525 = vset.pattern.permute.xlu0 %v529_v4  ;;  %v36_v7 = vld [vmem:[%s718_s1 + $0x8] sm:$0xff]  ;;  %v37_v9 = vld [vmem:[%s718_s1 + $0x10] sm:$0xff]  ;;  %vm220_vm3 = vcmask 261120   ;;  %15 = vst [vmem:[#allocation2] sm:$0x1] %v14_v61 }
   0x3   :  { %v39_v3 = vld [vmem:[%s718_s1 + $0x20] sm:$0xff]  ;;  %474 = vmatmul.mubr.msk.f32.vlgmr.msra.gmra.mrb[0].mxu0 %vm52_vm1, %v34_v2  ;;  %526 = vset.pattern.permute.xlu1 %v529_v4  ;;  %v42_v10 = vld [vmem:[%s718_s1 + $0x38] sm:$0xff]  ;;  %v210_v15 = vld [vmem:[%s719_s5 + $0x8] sm:$0xff]  ;;  %vm426_vm4 = vcmask 7168  }
   0x4   :  { %153 = vperm.xlu0 %525, %v39_v3   ;;  %v35_v6 = vld [vmem:[%s718_s1] sm:$0xff]  ;;  %484 = vmatprep.mubr.msk.f32.mxu0 %vm528_vm2, %v527_v0  ;;  %v38_v11 = vld [vmem:[%s718_s1 + $0x18] sm:$0xff]  ;;  %v211_v17 = vld [vmem:[%s719_s5 + $0x10] sm:$0xff] }
   0x5   :  { %158 = vperm.xlu1 %526, %v40_v5   ;;  %496 = vmatprep.mubr.msk.f32.mxu1 %vm528_vm2, %v527_v0  ;;  %v43_v12 = vld [vmem:[%s718_s1 + $0x40] sm:$0xff]  ;;  %v212_v18 = vld [vmem:[%s719_s5 + $0x18] sm:$0xff] }
   0x6   :  { %511 = vmatprep.subr.bf16.mxu0 %v530_v13  ;;  %517 = vmatprep.subr.bf16.mxu1 %v530_v13  ;;  %v209_v14 = vld [vmem:[%s719_s5] sm:$0xff]  ;;  %v515_v19 = vpack.c.bf16 %v212_v18, %v211_v17 }
   0x7   :  { %v512_v16 = vpack.c.bf16 %v210_v15, %v209_v14  ;;  %v443_v24 = vld [vmem:[%s720_s3] ss:$0 sm:$0xff] }
   0x8   :  { %133 = vperm.xlu0 %525, %v35_v6   ;;  %v440_v25 = vld [vmem:[%s721_s4] ss:$0 sm:$0xff] }
   0x9   :  { %138 = vperm.xlu1 %526, %v36_v7   ;;  %519 = vmatpush3.bf16.msra.mxu1 %v512_v16  ;;  %v444_v62 = vld [vmem:[%s723_s6] ss:$0 sm:$0xff] }
   0xa   :  { %513 = vmatpush3.bf16.msra.mxu0 %v512_v16  ;;  %518 = vmatprep.subr.bf16.mxu1 %v530_v13 }
   0xb   :  { %514 = vmatprep.subr.bf16.mxu0 %v530_v13 }
   0xc   :  { %163 = vperm.xlu0 %525, %v41_v8  }
   0xd   :  { %143 = vperm.xlu1 %526, %v37_v9   ;;  %520 = vmatpush3.bf16.msra.mxu1 %v515_v19 }
   0xe   :  { %516 = vmatpush3.bf16.msra.mxu0 %v515_v19 }
  0x10   :  { %168 = vperm.xlu0 %525, %v42_v10  }
  0x11   :  { %148 = vperm.xlu1 %526, %v38_v11  }
  0x14   :  { %173 = vperm.xlu0 %525, %v43_v12  }
  0x83   :  { %v154_v21 = vpop.permute.xlu0 %153 }
  0x84   :  { %v159_v20 = vpop.permute.xlu1 %158  ;;  %v186_v27 = vmul.f32 %v443_v24, %v154_v21 }
  0x85   :  { %v187_v31 = vmul.f32 %v443_v24, %v159_v20 }
  0x87   :  { %v134_v23 = vpop.permute.xlu0 %133 }
  0x88   :  { %v139_v22 = vpop.permute.xlu1 %138  ;;  %v182_v30 = vmul.f32 %v443_v24, %v134_v23 }
  0x89   :  { %v183_v32 = vmul.f32 %v443_v24, %v139_v22 }
  0x8b   :  { %v164_v28 = vpop.permute.xlu0 %163 }
  0x8c   :  { %v144_v26 = vpop.permute.xlu1 %143  ;;  %v188_v44 = vmul.f32 %v443_v24, %v164_v28 }
  0x8d   :  { %v184_v37 = vmul.f32 %v443_v24, %v144_v26 }
  0x8f   :  { %v169_v43 = vpop.permute.xlu0 %168 }
  0x90   :  { %v149_v38 = vpop.permute.xlu1 %148  ;;  %v189_v50 = vmul.f32 %v443_v24, %v169_v43 }
  0x91   :  { %v185_v45 = vmul.f32 %v443_v24, %v149_v38 }
  0x93   :  { %v174_v51 = vpop.permute.xlu0 %173 }
  0x94   :  { %v190_v56 = vmul.f32 %v443_v24, %v174_v51 }
  0xd6   :  { %v126_v29 = vpop.f32.mrb[0].mxu0 }
  0xd7   :  { %v127_v33 = vadd.f32 %v440_v25, %v126_v29  ;;  %v475_v34 = vpop.f32.mrb[1].mxu0 }
  0xd9   :  { %v191_v35 = vadd.f32 %v182_v30, %v127_v33  ;;  %v195_v36 = vadd.f32 %v186_v27, %v127_v33  ;;  %v192_v41 = vadd.f32 %v183_v32, %v127_v33  ;;  %v196_v42 = vadd.f32 %v187_v31, %v127_v33 }
  0xda   :  { %v193_v48 = vadd.f32 %v184_v37, %v127_v33  ;;  %v197_v49 = vadd.f32 %v188_v44, %v127_v33  ;;  %v194_v54 = vadd.f32 %v185_v45, %v127_v33  ;;  %v198_v55 = vadd.f32 %v189_v50, %v127_v33 }
  0xdb   :  { %v200_v39 = vmax.f32 %v191_v35, 0.0  ;;  %v204_v40 = vmax.f32 %v195_v36, 0.0  ;;  %v201_v46 = vmax.f32 %v192_v41, 0.0  ;;  %v205_v47 = vmax.f32 %v196_v42, 0.0 }
  0xdc   :  { %v202_v52 = vmax.f32 %v193_v48, 0.0  ;;  %v206_v53 = vmax.f32 %v197_v49, 0.0  ;;  %v203_v57 = vmax.f32 %v194_v54, 0.0  ;;  %v207_v58 = vmax.f32 %v198_v55, 0.0  ;;  %v455_v54 = vld [vmem:[#allocation2] ss:$0 sm:$0xff] }
  0xdd   :  { %485 = vmatmul.mubr.msk.f32.vlgmr.msra.gmra.mrb[2].mxu0 %vm220_vm3, %v200_v39  ;;  %497 = vmatmul.mubr.msk.f32.vlgmr.msra.gmra.mrb[0].mxu1 %vm220_vm3, %v204_v40  ;;  %v199_v59 = vadd.f32 %v190_v56, %v127_v33 }
  0xde   :  { %487 = vmatprep.mubr.msk.f32.mxu0 %vm528_vm2, %v527_v0  ;;  %499 = vmatprep.mubr.msk.f32.mxu1 %vm528_vm2, %v527_v0 }
  0xdf   :  { %v208_v60 = vmax.f32 %v199_v59, 0.0 }
  0xe1   :  { %488 = vmatmul.mubr.msk.f32.gmra.mrb[4].mxu0 %vm220_vm3, %v201_v46  ;;  %500 = vmatmul.mubr.msk.f32.gmra.mrb[2].mxu1 %vm220_vm3, %v205_v47 }
  0xe2   :  { %490 = vmatprep.mubr.msk.f32.mxu0 %vm528_vm2, %v527_v0  ;;  %502 = vmatprep.mubr.msk.f32.mxu1 %vm528_vm2, %v527_v0 }
  0xe5   :  { %491 = vmatmul.mubr.msk.f32.gmra.mrb[6].mxu0 %vm220_vm3, %v202_v52  ;;  %503 = vmatmul.mubr.msk.f32.gmra.mrb[4].mxu1 %vm220_vm3, %v206_v53 }
  0xe6   :  { %493 = vmatprep.mubr.msk.f32.mxu0 %vm528_vm2, %v527_v0  ;;  %505 = vmatprep.mubr.msk.f32.mxu1 %vm528_vm2, %v527_v0 }
  0xe9   :  { %494 = vmatmul.mubr.msk.f32.gmra.mrb[8].mxu0 %vm220_vm3, %v203_v57  ;;  %506 = vmatmul.mubr.msk.f32.gmra.mrb[6].mxu1 %vm220_vm3, %v207_v58 }
  0xea   :  { %508 = vmatprep.mubr.msk.f32.mxu1 %vm528_vm2, %v527_v0  ;;  %v454_v0 = vld [vmem:[%s724_s7] ss:$0 sm:$0xff] }
  0xed   :  { %509 = vmatmul.mubr.msk.f32.gmra.mrb[8].mxu1 %vm220_vm3, %v208_v60 }
 0x1b0   :  { %v314_v63 = vpop.f32.mrb[2].mxu0  ;;  %v334_v1 = vpop.f32.mrb[0].mxu1 }
 0x1b1   :  { %v315_v2 = vadd.f32 %v444_v62, %v314_v63  ;;  %v335_v3 = vadd.f32 %v444_v62, %v334_v1  ;;  %v486_v4 = vpop.f32.mrb[3].mxu0  ;;  %v498_v5 = vpop.f32.mrb[1].mxu1 }
 0x1b3   :  { %v358_v6 = vmax.f32 %v315_v2, 0.0  ;;  %v362_v7 = vmax.f32 %v335_v3, 0.0 }
 0x1b4   :  { %v319_v8 = vpop.f32.mrb[4].mxu0  ;;  %v339_v9 = vpop.f32.mrb[2].mxu1 }
 0x1b5   :  { %v320_v10 = vadd.f32 %v444_v62, %v319_v8  ;;  %v340_v11 = vadd.f32 %v444_v62, %v339_v9  ;;  %v489_v12 = vpop.f32.mrb[5].mxu0  ;;  %v501_v13 = vpop.f32.mrb[3].mxu1  ;;  %v378_v14 = vmul.f32 %v454_v0, %v362_v7  ;;  %v374_v15 = vmul.f32 %v454_v0, %v358_v6 }
 0x1b7   :  { %v359_v16 = vmax.f32 %v320_v10, 0.0  ;;  %v363_v17 = vmax.f32 %v340_v11, 0.0  ;;  %v395_v18 = vsel %vm220_vm3, %v378_v14, 0.0  ;;  %v383_v19 = vsel %vm220_vm3, %v374_v15, 0.0 }
 0x1b8   :  { %396 = vadd.xlane.f32.xlu0 %v395_v18  ;;  %v344_v20 = vpop.f32.mrb[4].mxu1  ;;  %384 = vadd.xlane.f32.xlu1 %v383_v19  ;;  %v324_v21 = vpop.f32.mrb[6].mxu0 }
 0x1b9   :  { %v345_v22 = vadd.f32 %v444_v62, %v344_v20  ;;  %v325_v23 = vadd.f32 %v444_v62, %v324_v21  ;;  %v492_v24 = vpop.f32.mrb[7].mxu0  ;;  %v504_v25 = vpop.f32.mrb[5].mxu1  ;;  %v379_v26 = vmul.f32 %v454_v0, %v363_v17  ;;  %v375_v27 = vmul.f32 %v454_v0, %v359_v16 }
 0x1bb   :  { %v364_v28 = vmax.f32 %v345_v22, 0.0  ;;  %v360_v29 = vmax.f32 %v325_v23, 0.0  ;;  %v398_v30 = vsel %vm220_vm3, %v379_v26, 0.0  ;;  %v386_v31 = vsel %vm220_vm3, %v375_v27, 0.0 }
 0x1bc   :  { %v349_v32 = vpop.f32.mrb[6].mxu1  ;;  %399 = vadd.xlane.f32.xlu1 %v398_v30  ;;  %387 = vadd.xlane.f32.xlu0 %v386_v31  ;;  %v329_v33 = vpop.f32.mrb[8].mxu0 }
 0x1bd   :  { %v350_v34 = vadd.f32 %v444_v62, %v349_v32  ;;  %v330_v35 = vadd.f32 %v444_v62, %v329_v33  ;;  %v495_v36 = vpop.f32.mrb[9].mxu0  ;;  %v507_v37 = vpop.f32.mrb[7].mxu1  ;;  %v376_v38 = vmul.f32 %v454_v0, %v360_v29  ;;  %v380_v42 = vmul.f32 %v454_v0, %v364_v28 }
 0x1bf   :  { %v365_v39 = vmax.f32 %v350_v34, 0.0  ;;  %v361_v40 = vmax.f32 %v330_v35, 0.0  ;;  %v389_v41 = vsel %vm220_vm3, %v376_v38, 0.0  ;;  %v401_v48 = vsel %vm220_vm3, %v380_v42, 0.0 }
 0x1c0   :  { %v354_v43 = vpop.f32.mrb[8].mxu1  ;;  %390 = vadd.xlane.f32.xlu0 %v389_v41 }
 0x1c1   :  { %v355_v44 = vadd.f32 %v444_v62, %v354_v43  ;;  %v510_v45 = vpop.f32.mrb[9].mxu1  ;;  %v377_v46 = vmul.f32 %v454_v0, %v361_v40  ;;  %v381_v50 = vmul.f32 %v454_v0, %v365_v39 }
 0x1c3   :  { %v366_v47 = vmax.f32 %v355_v44, 0.0  ;;  %v392_v49 = vsel %vm220_vm3, %v377_v46, 0.0  ;;  %v404_v53 = vsel %vm220_vm3, %v381_v50, 0.0 }
 0x1c4   :  { %402 = vadd.xlane.f32.xlu0 %v401_v48  ;;  %393 = vadd.xlane.f32.xlu1 %v392_v49 }
 0x1c5   :  { %v382_v51 = vmul.f32 %v454_v0, %v366_v47 }
 0x1c7   :  { %v407_v52 = vsel %vm220_vm3, %v382_v51, 0.0 }
 0x1c8   :  { %408 = vadd.xlane.f32.xlu0 %v407_v52  ;;  %405 = vadd.xlane.f32.xlu1 %v404_v53 }
 0x245   :  { %v397_v55 = vpop.xlane.xlu0 %396  ;;  %v385_v56 = vpop.xlane.xlu1 %384 }
 0x246   :  { %v421_v57 = vadd.f32 %v455_v54, %v397_v55  ;;  %v417_v58 = vadd.f32 %v455_v54, %v385_v56 }
 0x248   :  { %431 = vst.msk [vmem:[%s725_s9 + $0x20] sm:$0xff] %vm426_vm4, %v421_v57  ;;  %427 = vst.msk [vmem:[%s725_s9] sm:$0xff] %vm426_vm4, %v417_v58 }
 0x249   :  { %v400_v59 = vpop.xlane.xlu1 %399  ;;  %v388_v60 = vpop.xlane.xlu0 %387 }
 0x24a   :  { %v422_v61 = vadd.f32 %v455_v54, %v400_v59  ;;  %v418_v62 = vadd.f32 %v455_v54, %v388_v60 }
 0x24c   :  { %432 = vst.msk [vmem:[%s725_s9 + $0x28] sm:$0xff] %vm426_vm4, %v422_v61  ;;  %428 = vst.msk [vmem:[%s725_s9 + $0x8] sm:$0xff] %vm426_vm4, %v418_v62 }
 0x24d   :  { %v391_v63 = vpop.xlane.xlu0 %390 }
 0x24e   :  { %v419_v1 = vadd.f32 %v455_v54, %v391_v63 }
 0x250   :  { %429 = vst.msk [vmem:[%s725_s9 + $0x10] sm:$0xff] %vm426_vm4, %v419_v1 }
 0x251   :  { %v403_v2 = vpop.xlane.xlu0 %402  ;;  %v394_v3 = vpop.xlane.xlu1 %393 }
 0x252   :  { %v423_v4 = vadd.f32 %v455_v54, %v403_v2  ;;  %v420_v5 = vadd.f32 %v455_v54, %v394_v3 }
 0x254   :  { %433 = vst.msk [vmem:[%s725_s9 + $0x30] sm:$0xff] %vm426_vm4, %v423_v4  ;;  %430 = vst.msk [vmem:[%s725_s9 + $0x18] sm:$0xff] %vm426_vm4, %v420_v5 }
 0x255   :  { %v409_v0 = vpop.xlane.xlu0 %408  ;;  %v406_v6 = vpop.xlane.xlu1 %405 }
 0x256   :  { %v425_v7 = vadd.f32 %v455_v54, %v409_v0  ;;  %v424_v8 = vadd.f32 %v455_v54, %v406_v6 }
 0x258   :  { %435 = vst.msk [vmem:[%s725_s9 + $0x40] sm:$0xff] %vm426_vm4, %v425_v7  ;;  %434 = vst.msk [vmem:[%s725_s9 + $0x38] sm:$0xff] %vm426_vm4, %v424_v8 }

</bundles_post_ra>
